<compile_context>
chip_gen: v7x
topology: tpu7x:2x2x1
jax: 0.10.0
libtpu: 0.0.40
codegen_flags: <defaults>
</compile_context>

<pallas_src>
import functools

import jax
import jax.numpy as jnp
from jax.experimental import pallas as pl
from jax.experimental.pallas import tpu as pltpu


def _round_up(n, m):
    return ((n + m - 1) // m) * m


def _pad2(a, rows, cols):
    pr, pc = rows - a.shape[0], cols - a.shape[1]
    if pr or pc:
        a = jnp.pad(a, ((0, pr), (0, pc)))
    return a


def _mlp_kernel(x_ref, w1_ref, b1_ref, w2_ref, b2_ref, o_ref, acc_ref, *,
                activation):
    """One (i = B-tile, j = G-tile, k = H-tile) grid step.

    hidden_k = act(x_i @ W1[:, k] + b1[k])     # f32 bias + activation
    acc_ij  += hidden_k @ W2m[k, j]            # bf16 MXU, f32 accumulate
    out_ij   = acc_ij + b2[j]                  # on the last k step
    """
    k = pl.program_id(2)

    @pl.when(k == 0)
    def _init():
        acc_ref[...] = jnp.zeros_like(acc_ref)

    # First matmul: full-E reduction in one MXU pass, f32 accumulation.
    h = jnp.dot(x_ref[...], w1_ref[...],
                preferred_element_type=jnp.float32) + b1_ref[...]
    if activation == "relu":
        h = jnp.maximum(h, 0.0)
    else:  # 'tanh' (EUP)
        h = jnp.tanh(h)

    # Second matmul: accumulate the H (reduction) grid axis in VMEM scratch.
    acc_ref[...] += jnp.dot(h.astype(w2_ref.dtype), w2_ref[...],
                            preferred_element_type=jnp.float32)

    @pl.when(k == pl.num_programs(2) - 1)
    def _finalize():
        o_ref[...] = (acc_ref[...] + b2_ref[...]).astype(o_ref.dtype)


def model_base_forward(x, w1, b1, w2, tf_gene_mask, b2, *,
                       activation="relu",
                       mxu_dtype=jnp.bfloat16,
                       out_dtype=jnp.float32,
                       tb_target=256, th_target=512, tg_target=512):
    """Fused hidden + masked output projection, tiled over (B, G, H)."""
    B, E = x.shape
    H = w1.shape[1]
    G = w2.shape[1]

    # ---- Weight prep (batch independent, outside the kernel) ---------------
    # Fold the 0/1 tf_gene mask into W2 once (mask01 semantics).
    w2m = w2 * tf_gene_mask

    # ---- Tile / padding plan ------------------------------------------------
    tb = min(tb_target, _round_up(B, 8))      # batch rows per tile (sublane)
    th = min(th_target, _round_up(H, 128))    # hidden cols per tile (lane)
    tg = min(tg_target, _round_up(G, 128))    # gep cols per tile (lane)
    Bp, Hp, Gp = _round_up(B, tb), _round_up(H, th), _round_up(G, tg)

    xp = _pad2(x, Bp, E).astype(mxu_dtype)
    w1p = _pad2(w1, E, Hp).astype(mxu_dtype)
    w2p = _pad2(w2m, Hp, Gp).astype(mxu_dtype)
    b1p = _pad2(b1, 1, Hp).astype(jnp.float32)
    b2p = _pad2(b2, 1, Gp).astype(jnp.float32)

    grid = (Bp // tb, Gp // tg, Hp // th)

    # ---- Scheduling hints ----------------------------------------------------
    in_bytes = sum(int(a.size) * a.dtype.itemsize
                   for a in (xp, w1p, b1p, w2p, b2p))
    out_bytes = Bp * Gp * jnp.dtype(out_dtype).itemsize
    cost = pl.CostEstimate(
        flops=2 * B * (E * H + H * G),
        transcendentals=(B * H if activation == "tanh" else 0),
        bytes_accessed=in_bytes + out_bytes,
    )

    itm = jnp.dtype(mxu_dtype).itemsize
    tile_bytes = (
        2 * (tb * E + E * th + th * tg) * itm            # double-buffered MXU tiles
        + 2 * (th + tg) * 4                              # f32 bias tiles
        + 2 * tb * tg * jnp.dtype(out_dtype).itemsize    # output tile
        + tb * tg * 4                                    # f32 accumulator
    )
    # Explicit budget: enough for the tile plan with headroom, but kept well
    # under the 64 MiB physical VMEM of v7x.
    vmem_limit = int(min(max(2 * tile_bytes, 32 * 1024 * 1024),
                         48 * 1024 * 1024))

    kernel = functools.partial(_mlp_kernel, activation=activation)

    out_p = pl.pallas_call(
        kernel,
        out_shape=jax.ShapeDtypeStruct((Bp, Gp), out_dtype),
        grid_spec=pltpu.PrefetchScalarGridSpec(
            num_scalar_prefetch=0,
            grid=grid,
            in_specs=[
                pl.BlockSpec((tb, E), lambda i, j, k: (i, 0)),    # x
                pl.BlockSpec((E, th), lambda i, j, k: (0, k)),    # W1
                pl.BlockSpec((1, th), lambda i, j, k: (0, k)),    # b1
                pl.BlockSpec((th, tg), lambda i, j, k: (k, j)),   # masked W2
                pl.BlockSpec((1, tg), lambda i, j, k: (0, j)),    # b2
            ],
            out_specs=pl.BlockSpec((tb, tg), lambda i, j, k: (i, j)),
            scratch_shapes=[pltpu.VMEM((tb, tg), jnp.float32)],
        ),
        compiler_params=pltpu.CompilerParams(
            dimension_semantics=("parallel", "parallel", "arbitrary"),
            vmem_limit_bytes=vmem_limit,
        ),
        cost_estimate=cost,
    )(xp, w1p, b1p, w2p, b2p)

    return out_p[:B, :G]


def reference_forward(x, w1, b1, w2, tf_gene_mask, b2, *, activation="relu"):
    h = x @ w1 + b1
    h = jnp.maximum(h, 0.0) if activation == "relu" else jnp.tanh(h)
    return h @ (w2 * tf_gene_mask) + b2


if __name__ == "__main__":
    # Small shapes consistent with the module's hyperparameters.
    B = 8                  # batch
    embedding_size = 32
    hidden_size = 64
    gep_size = 128

    key = jax.random.PRNGKey(0)
    k_x, k_w1, k_b1, k_w2, k_b2, k_m = jax.random.split(key, 6)

    x = jax.random.normal(k_x, (B, embedding_size), dtype=jnp.float32)
    w1 = 0.1 * jax.random.normal(k_w1, (embedding_size, hidden_size),
                                 dtype=jnp.float32)
    b1 = 0.1 * jax.random.normal(k_b1, (1, hidden_size), dtype=jnp.float32)
    w2 = 0.1 * jax.random.normal(k_w2, (hidden_size, gep_size),
                                 dtype=jnp.float32)
    b2 = 0.1 * jax.random.normal(k_b2, (1, gep_size), dtype=jnp.float32)
    # tf_gene mask (mask01 = True): deterministic 0/1 mask.
    tf_gene_mask = (jax.random.uniform(k_m, (hidden_size, gep_size))
                    > 0.5).astype(jnp.float32)

    ok = True
    for activation in ("relu", "tanh"):
        out = model_base_forward(x, w1, b1, w2, tf_gene_mask, b2,
                                 activation=activation)
        out = jax.block_until_ready(out)
        ref = reference_forward(x, w1, b1, w2, tf_gene_mask, b2,
                                activation=activation)
        assert out.shape == (B, gep_size)
        # bf16 MXU operands with f32 accumulation -> loosened tolerance.
        ok = ok and bool(jnp.allclose(out, ref, atol=2e-2, rtol=2e-2))

    assert ok
    print("KERNEL_OK")
</pallas_src>

<mosaic_0001>
module attributes {stable_mosaic.version = 11 : i64} {
  func.func @_mlp_kernel(%arg0: i32, %arg1: i32, %arg2: i32, %arg3: memref<8x32xbf16, #tpu.memory_space<vmem>>, %arg4: memref<32x128xbf16, #tpu.memory_space<vmem>>, %arg5: memref<1x128xf32, #tpu.memory_space<vmem>>, %arg6: memref<128x128xbf16, #tpu.memory_space<vmem>>, %arg7: memref<1x128xf32, #tpu.memory_space<vmem>>, %arg8: memref<8x128xf32, #tpu.memory_space<vmem>>, %arg9: memref<8x128xf32, #tpu.memory_space<vmem>>) attributes {dimension_semantics = [#tpu.dimension_semantics<parallel>, #tpu.dimension_semantics<parallel>, #tpu.dimension_semantics<arbitrary>], iteration_bounds = array<i64: 1, 1, 1>, scalar_prefetch = 0 : i64, scratch_operands = 1 : i64, tpu.core_type = #tpu.core_type<tc>, window_params = [{transform_indices = @transform_0, window_bounds = array<i64: 8, 32>}, {transform_indices = @transform_1, window_bounds = array<i64: 32, 128>}, {transform_indices = @transform_2, window_bounds = array<i64: 1, 128>}, {transform_indices = @transform_3, window_bounds = array<i64: 128, 128>}, {transform_indices = @transform_4, window_bounds = array<i64: 1, 128>}, {transform_indices = @transform_5, window_bounds = array<i64: 8, 128>}]} {
    %c0_i32 = arith.constant 0 : i32
    %0 = arith.cmpi eq, %arg2, %c0_i32 : i32
    %1 = arith.extui %0 : i1 to i32
    %c0_i32_0 = arith.constant 0 : i32
    %2 = arith.cmpi ne, %1, %c0_i32_0 : i32
    scf.if %2 {
      %cst_16 = arith.constant 0.000000e+00 : f32
      %20 = vector.broadcast %cst_16 : f32 to vector<8x128xf32>
      %c0_17 = arith.constant 0 : index
      %c0_18 = arith.constant 0 : index
      %21 = vector.load %arg9[%c0_17, %c0_18] : memref<8x128xf32, #tpu.memory_space<vmem>>, vector<8x128xf32>
      tpu.vector_store %arg9[%c0_17, %c0_18], %20 {strides = array<i32>} : memref<8x128xf32, #tpu.memory_space<vmem>>, vector<8x128xf32>,
    } else {
    }
    %c0 = arith.constant 0 : index
    %c0_1 = arith.constant 0 : index
    %3 = vector.load %arg3[%c0, %c0_1] : memref<8x32xbf16, #tpu.memory_space<vmem>>, vector<8x32xbf16>
    %c0_2 = arith.constant 0 : index
    %c0_3 = arith.constant 0 : index
    %4 = vector.load %arg4[%c0_2, %c0_3] : memref<32x128xbf16, #tpu.memory_space<vmem>>, vector<32x128xbf16>
    %cst = arith.constant dense<0.000000e+00> : vector<8x128xf32>
    %5 = tpu.matmul %3, %4, %cst {dimension_numbers = #tpu.dot_dimension_numbers<[1], [0], [0], [1], [0, 0, 1, 1], [], []>} : vector<8x32xbf16>, vector<32x128xbf16>, vector<8x128xf32> -> vector<8x128xf32>
    %c0_4 = arith.constant 0 : index
    %c0_5 = arith.constant 0 : index
    %6 = vector.load %arg5[%c0_4, %c0_5] : memref<1x128xf32, #tpu.memory_space<vmem>>, vector<1x128xf32>
    %7 = vector.broadcast %6 : vector<1x128xf32> to vector<8x128xf32>
    %8 = arith.addf %5, %7 : vector<8x128xf32>
    %cst_6 = arith.constant 0.000000e+00 : f32
    %9 = vector.broadcast %cst_6 : f32 to vector<8x128xf32>
    %10 = arith.maximumf %8, %9 : vector<8x128xf32>
    %c0_7 = arith.constant 0 : index
    %c0_8 = arith.constant 0 : index
    %11 = vector.load %arg9[%c0_7, %c0_8] : memref<8x128xf32, #tpu.memory_space<vmem>>, vector<8x128xf32>
    %12 = arith.truncf %10 : vector<8x128xf32> to vector<8x128xbf16>
    %c0_9 = arith.constant 0 : index
    %c0_10 = arith.constant 0 : index
    %13 = vector.load %arg6[%c0_9, %c0_10] : memref<128x128xbf16, #tpu.memory_space<vmem>>, vector<128x128xbf16>
    %cst_11 = arith.constant dense<0.000000e+00> : vector<8x128xf32>
    %14 = tpu.matmul %12, %13, %cst_11 {dimension_numbers = #tpu.dot_dimension_numbers<[1], [0], [0], [1], [0, 0, 1, 1], [], []>} : vector<8x128xbf16>, vector<128x128xbf16>, vector<8x128xf32> -> vector<8x128xf32>
    %15 = arith.addf %11, %14 : vector<8x128xf32>
    %c0_12 = arith.constant 0 : index
    %c0_13 = arith.constant 0 : index
    %16 = vector.load %arg9[%c0_12, %c0_13] : memref<8x128xf32, #tpu.memory_space<vmem>>, vector<8x128xf32>
    tpu.vector_store %arg9[%c0_12, %c0_13], %15 {strides = array<i32>} : memref<8x128xf32, #tpu.memory_space<vmem>>, vector<8x128xf32>,
    %c0_i32_14 = arith.constant 0 : i32
    %17 = arith.cmpi eq, %arg2, %c0_i32_14 : i32
    %18 = arith.extui %17 : i1 to i32
    %c0_i32_15 = arith.constant 0 : i32
    %19 = arith.cmpi ne, %18, %c0_i32_15 : i32
    scf.if %19 {
      %c0_16 = arith.constant 0 : index
      %c0_17 = arith.constant 0 : index
      %20 = vector.load %arg9[%c0_16, %c0_17] : memref<8x128xf32, #tpu.memory_space<vmem>>, vector<8x128xf32>
      %c0_18 = arith.constant 0 : index
      %c0_19 = arith.constant 0 : index
      %21 = vector.load %arg7[%c0_18, %c0_19] : memref<1x128xf32, #tpu.memory_space<vmem>>, vector<1x128xf32>
      %22 = vector.broadcast %21 : vector<1x128xf32> to vector<8x128xf32>
      %23 = arith.addf %20, %22 : vector<8x128xf32>
      %c0_20 = arith.constant 0 : index
      %c0_21 = arith.constant 0 : index
      %24 = vector.load %arg8[%c0_20, %c0_21] : memref<8x128xf32, #tpu.memory_space<vmem>>, vector<8x128xf32>
      tpu.vector_store %arg8[%c0_20, %c0_21], %23 {strides = array<i32>} : memref<8x128xf32, #tpu.memory_space<vmem>>, vector<8x128xf32>,
    } else {
    }
    return
  }
  func.func @transform_0(%arg0: i32, %arg1: i32, %arg2: i32) -> (i32, i32) {
    %c0_i32 = arith.constant 0 : i32
    %c0_i32_0 = arith.constant 0 : i32
    return %arg0, %c0_i32 : i32, i32
  }
  func.func @transform_1(%arg0: i32, %arg1: i32, %arg2: i32) -> (i32, i32) {
    %c0_i32 = arith.constant 0 : i32
    %c0_i32_0 = arith.constant 0 : i32
    return %c0_i32, %arg2 : i32, i32
  }
  func.func @transform_2(%arg0: i32, %arg1: i32, %arg2: i32) -> (i32, i32) {
    %c0_i32 = arith.constant 0 : i32
    %c0_i32_0 = arith.constant 0 : i32
    return %c0_i32, %arg2 : i32, i32
  }
  func.func @transform_3(%arg0: i32, %arg1: i32, %arg2: i32) -> (i32, i32) {
    %c0_i32 = arith.constant 0 : i32
    return %arg2, %arg1 : i32, i32
  }
  func.func @transform_4(%arg0: i32, %arg1: i32, %arg2: i32) -> (i32, i32) {
    %c0_i32 = arith.constant 0 : i32
    %c0_i32_0 = arith.constant 0 : i32
    return %c0_i32, %arg1 : i32, i32
  }
  func.func @transform_5(%arg0: i32, %arg1: i32, %arg2: i32) -> (i32, i32) {
    %c0_i32 = arith.constant 0 : i32
    return %arg0, %arg1 : i32, i32
  }
}

</mosaic_0001>

<bundles_post_ra>
// kernel: tpu_custom_call.1
= control target key start
LH: loop header
LB: loop body
LE: loop exit
PB: predicated region body
PF: predicated region fallthrough
CT: control target
= control target key end

     0   :  { %10 = vsyncpa [#allocation4], 0  ;;  %s535_s0 = inlined_call_operand.hbm [shape: bf16[8,32], index: 0, kind: input, shape index: {}]   ;;  %s536_s1 = inlined_call_operand.hbm [shape: bf16[32,128], index: 1, kind: input, shape index: {}]   ;;  %s537_s2 = inlined_call_operand.vmem [shape: f32[1,128], index: 2, kind: input, shape index: {}]   ;;  %s538_s3 = inlined_call_operand.hbm [shape: bf16[128,128], index: 3, kind: input, shape index: {}]   ;;  %s539_s4 = inlined_call_operand.vmem [shape: f32[1,128], index: 4, kind: input, shape index: {}]   ;;  %s540_s5 = inlined_call_operand.hbm [shape: f32[8,128], index: 5, kind: output, shape index: {}]  }
   0x1   :  { %11 = vsyncpa [#allocation7], 0 }
   0x2   :  { %12 = vsyncpa [#allocation5], 0  ;;  %s437_s18 = smov [#allocation6]   ;;  %s343_s22 = scalar_lea.hbm %s536_s1, 256 }
   0x3   :  { %s28_s19 = sshll.u32 %s437_s18, 4  ;;  %p344_p0 = scmp.ne.s32.totalorder %s536_s1, %s343_s22  ;;  %s29_s19 = int_to_ptr.vmem [resolvable:$true] %s28_s19 }
   0x4   :  { %p347_p1 = scmp.lt.u32.totalorder %s343_s22, %s536_s1 }
   0x6   :  { %p349_p2 = pnand %p347_p1, %p344_p0 }
   0x8   :  { %352 = shalt.err (!%p349_p2)
}
   0x9   :  { %s353_s27 = scalar_lea.vmem %s29_s19, 256  ;;  %p358_p4 = scmp.lt.s32.totalorder %s29_s19, %s29_s19 }
   0xa   :  { %p354_p3 = scmp.ne.s32.totalorder %s29_s19, %s353_s27  ;;  %p359_p5 = scmp.lt.s32.totalorder %s353_s27, %s353_s27 }
   0xc   :  { %p360_p6 = por %p359_p5, %p358_p4 }
   0xe   :  { %p361_p7 = pnand %p360_p6, %p354_p3 }
  0x10   :  { %364 = shalt.err (!%p361_p7)
}
  0x11   :  { %s438_s28 = smov 64   ;;  %s439_s29 = smov 4  }
  0x12   :  { %34 = dma.hbm_to_vmem [thread:$0]  %s536_s1, 256, %s29_s19, [#allocation7], %s438_s28, %s438_s28, %s439_s29  }
  0x13   :  { %s440_s7 = smov [#allocation3]   ;;  %s441_s9 = smov [#allocation8]  }
  0x14   :  { %s19_s8 = sshll.u32 %s440_s7, 4  ;;  %s42_s10 = sshll.u32 %s441_s9, 4  ;;  %s20_s8 = int_to_ptr.vmem [resolvable:$true] %s19_s8  ;;  %s43_s10 = int_to_ptr.vmem [resolvable:$true] %s42_s10 }
  0x15   :  { %s365_s13 = scalar_lea.hbm %s535_s0, 64 }
  0x16   :  { %p366_p8 = scmp.ne.s32.totalorder %s535_s0, %s365_s13  ;;  %p369_p9 = scmp.lt.u32.totalorder %s365_s13, %s535_s0 }
  0x18   :  { %p371_p10 = pnand %p369_p9, %p366_p8 }
  0x1a   :  { %374 = shalt.err (!%p371_p10)
}
  0x1b   :  { %s375_s1 = scalar_lea.vmem %s20_s8, 64  ;;  %p380_p12 = scmp.lt.s32.totalorder %s20_s8, %s20_s8 }
  0x1c   :  { %p376_p11 = scmp.ne.s32.totalorder %s20_s8, %s375_s1  ;;  %p381_p13 = scmp.lt.s32.totalorder %s375_s1, %s375_s1 }
  0x1e   :  { %p382_p0 = por %p381_p13, %p380_p12 }
  0x20   :  { %p383_p1 = pnand %p382_p0, %p376_p11 }
  0x22   :  { %386 = shalt.err (!%p383_p1)
}
  0x23   :  { %22 = dma.hbm_to_vmem [thread:$0]  %s535_s0, 64, %s20_s8, [#allocation4]  }
  0x24   :  { %s387_s22 = scalar_lea.hbm %s538_s3, 1024 }
  0x25   :  { %p388_p2 = scmp.ne.s32.totalorder %s538_s3, %s387_s22  ;;  %p391_p3 = scmp.lt.u32.totalorder %s387_s22, %s538_s3 }
  0x27   :  { %p393_p4 = pnand %p391_p3, %p388_p2 }
  0x29   :  { %396 = shalt.err (!%p393_p4)
}
  0x2a   :  { %s397_s27 = scalar_lea.vmem %s43_s10, 1024  ;;  %p402_p6 = scmp.lt.s32.totalorder %s43_s10, %s43_s10 }
  0x2b   :  { %p398_p5 = scmp.ne.s32.totalorder %s43_s10, %s397_s27  ;;  %p403_p7 = scmp.lt.s32.totalorder %s397_s27, %s397_s27 }
  0x2d   :  { %p404_p8 = por %p403_p7, %p402_p6 }
  0x2f   :  { %p405_p9 = pnand %p404_p8, %p398_p5 }
  0x31   :  { %408 = shalt.err (!%p405_p9)
}
  0x32   :  { %48 = dma.hbm_to_vmem [thread:$0]  %s538_s3, 1024, %s43_s10, [#allocation7], %s438_s28, %s438_s28, %s439_s29  }
  0x33   :  { %431 = dma.done.wait [#allocation4], 64  }
  0x34   :  { %432 = vsyncadd [#allocation4], 4294967232 }
  0x35   :  { %433 = dma.done.wait [#allocation7], 1280  }
  0x36   :  { %434 = vsyncadd [#allocation7], 4294966016  ;;  %v442_v0 = vmov 0.0   ;;  %vm443_vm0 = vmmov 0   ;;  %v333_v1 = vld [vmem:[#allocation6] sm:$0xff]   ;;  %v334_v2 = vld [vmem:[#allocation6 + $0x8] sm:$0xff]  }
  0x37   :  { %297 = vmatprep.subr.bf16.mxu0 %v442_v0  ;;  %301 = vmatprep.mubr.msk.bf16.mxu0 %vm443_vm0, %v442_v0  ;;  %v335_v3 = vld [vmem:[#allocation8] sm:$0xff]   ;;  %vm90_vm1 = vcmask 261120   ;;  %v336_v4 = vld [vmem:[#allocation8 + $0x8] sm:$0xff]   ;;  %v337_v6 = vld [vmem:[#allocation8 + $0x10] sm:$0xff]   ;;  %s444_s7 = smov [#allocation9]  }
  0x38   :  { %305 = vmatprep.subr.bf16.mxu1 %v442_v0  ;;  %321 = vmatprep.mubr.msk.bf16.mxu1 %vm443_vm0, %v442_v0  ;;  %v66_v5 = vld [vmem:[#allocation3] sm:$0xf]  ;;  %v338_v7 = vld [vmem:[#allocation8 + $0x18] sm:$0xff]   ;;  %v339_v8 = vld [vmem:[#allocation8 + $0x20] sm:$0xff]   ;;  %s262_s8 = sshll.u32 %s444_s7, 4  ;;  %s263_s8 = int_to_ptr.vmem [resolvable:$true] %s262_s8 }
  0x39   :  { %298 = vmatpush3.bf16.msra.mxu0 %v333_v1  ;;  %306 = vmatpush3.bf16.msra.mxu1 %v335_v3  ;;  %v340_v9 = vld [vmem:[#allocation8 + $0x28] sm:$0xff]   ;;  %v341_v10 = vld [vmem:[#allocation8 + $0x30] sm:$0xff]   ;;  %v342_v11 = vld [vmem:[#allocation8 + $0x38] sm:$0xff]   ;;  %p414_p11 = scmp.lt.s32.totalorder %s263_s8, %s263_s8 }
  0x3a   :  { %299 = vmatprep.subr.bf16.mxu0 %v442_v0  ;;  %307 = vmatprep.subr.bf16.mxu1 %v442_v0  ;;  %v272_v12 = vld [vmem:[%s537_s2] ss:$0 sm:$0xff]  ;;  %s409_s2 = scalar_lea.vmem %s263_s8, 128 }
  0x3b   :  { %v284_v20 = vld [vmem:[%s539_s4] ss:$0 sm:$0xff]  ;;  %p410_p10 = scmp.ne.s32.totalorder %s263_s8, %s409_s2  ;;  %p415_p12 = scmp.lt.s32.totalorder %s409_s2, %s409_s2 }
  0x3d   :  { %300 = vmatpush3.bf16.msra.mxu0 %v334_v2  ;;  %308 = vmatpush3.bf16.msra.mxu1 %v336_v4  ;;  %p416_p13 = por %p415_p12, %p414_p11 }
  0x3e   :  { %309 = vmatprep.subr.bf16.mxu1 %v442_v0 }
  0x3f   :  { %p417_p0 = pnand %p416_p13, %p410_p10 }
  0x40   :  { %302 = vmatmul.mubr.msk.bf16.vlgmr.msra.gmra.mrb[0].mxu0 %vm90_vm1, %v66_v5 }
  0x41   :  { %310 = vmatpush3.bf16.msra.mxu1 %v337_v6 }
  0x42   :  { %311 = vmatprep.subr.bf16.mxu1 %v442_v0 }
  0x45   :  { %312 = vmatpush3.bf16.msra.mxu1 %v338_v7 }
  0x46   :  { %313 = vmatprep.subr.bf16.mxu1 %v442_v0 }
  0x49   :  { %314 = vmatpush3.bf16.msra.mxu1 %v339_v8 }
  0x4a   :  { %315 = vmatprep.subr.bf16.mxu1 %v442_v0 }
  0x4d   :  { %316 = vmatpush3.bf16.msra.mxu1 %v340_v9 }
  0x4e   :  { %317 = vmatprep.subr.bf16.mxu1 %v442_v0 }
  0x51   :  { %318 = vmatpush3.bf16.msra.mxu1 %v341_v10 }
  0x52   :  { %319 = vmatprep.subr.bf16.mxu1 %v442_v0 }
  0x55   :  { %320 = vmatpush3.bf16.msra.mxu1 %v342_v11 }
 0x113   :  { %v128_v13 = vpop.f32.mrb[0].mxu0 }
 0x114   :  { %v129_v14 = vadd.f32 %v272_v12, %v128_v13  ;;  %v303_v15 = vpop.f32.mrb[1].mxu0 }
 0x115   :  { %v131_v16 = vpop.f32.mrb[2].mxu0 }
 0x116   :  { %v134_v17 = vmax.f32 %v129_v14, 0.0  ;;  %v304_v18 = vpop.f32.mrb[3].mxu0 }
 0x118   :  { %v136_v19 = vpack.c.bf16 %v134_v17, %v134_v17 }
 0x11a   :  { %322 = vmatmul.mubr.bf16.vlgmr.msra.gmra.mrb[0].mxu1 %v136_v19 }
 0x1ed   :  { %v235_v21 = vpop.f32.mrb[0].mxu1 }
 0x1ee   :  { %v254_v22 = vadd.f32 %v284_v20, %v235_v21  ;;  %v323_v23 = vpop.f32.mrb[1].mxu1 }
 0x1ef   :  { %v238_v24 = vpop.f32.mrb[2].mxu1 }
 0x1f0   :  { %255 = vst [vmem:[#allocation9] sm:$0xff] %v254_v22  ;;  %v324_v25 = vpop.f32.mrb[3].mxu1 }
 0x1f1   :  { %420 = shalt.err (!%p417_p0)
}
 0x1f2   :  { %s421_s4 = scalar_lea.hbm %s540_s5, 128 }
 0x1f3   :  { %p422_p1 = scmp.ne.s32.totalorder %s540_s5, %s421_s4  ;;  %p425_p2 = scmp.lt.u32.totalorder %s421_s4, %s540_s5 }
 0x1f5   :  { %p427_p3 = pnand %p425_p2, %p422_p1 }
 0x1f7   :  { %430 = shalt.err (!%p427_p3)
}
 0x1f8   :  { %265 = dma.vmem_to_hbm [thread:$0]  %s263_s8, 128, %s540_s5, [#allocation5]  }
 0x1f9   :  { %435 = dma.done.wait [#allocation5], 128  }
 0x1fa   :  { %436 = vsyncadd [#allocation5], 4294967168 }
 0x1fb   :  { %269 = vsyncpa [#allocation4], 1 }
 0x1fc   :  { %270 = vsyncpa [#allocation7], 1 }
 0x1fd   :  { %271 = vsyncpa [#allocation5], 1 }

</bundles_post_ra>
